<compile_context>
chip_gen: v5e
topology: v5e:2x2
jax: 0.10.0
libtpu: 0.0.40
codegen_flags: <defaults>
</compile_context>

<pallas_src>
import functools

import jax
import jax.numpy as jnp
from jax.experimental import pallas as pl
from jax.experimental.pallas import tpu as pltpu


K_PAD = 128      # lane-dense padded input-feature dim (real features in [:, :8])
N_OUT_PAD = 128  # lane-dense logits slab (real logits live in [:, :4])


def policy_mlp_kernel(x_ref, w1_ref, b1_ref, w2_ref, b2_ref, w3_ref, b3_ref,
                      out_ref):
    """One batch tile of the fused 3-layer MLP.

    x_ref:  (TM, 128)      f32   (columns >= 8 are zero padding)
    w*_ref: (in, out)      bf16  (VMEM-resident across grid steps)
    b*_ref: (1, out)       f32
    out:    (TM, 128)      f32   (columns >= 4 are zero padding)
    """
    x = x_ref[...]                                            # (TM, 128) f32

    # fc1 + ReLU: bf16 operands on the MXU, f32 accumulate, f32 VPU epilogue.
    h1 = jnp.dot(x.astype(jnp.bfloat16), w1_ref[...],
                 preferred_element_type=jnp.float32)
    h1 = jnp.maximum(h1 + b1_ref[...], 0.0)                   # (TM, 256) f32

    # fc2 + ReLU.
    h2 = jnp.dot(h1.astype(jnp.bfloat16), w2_ref[...],
                 preferred_element_type=jnp.float32)
    h2 = jnp.maximum(h2 + b2_ref[...], 0.0)                   # (TM, 256) f32

    # fc3 (logits, padded to 128 lanes for an unmasked store).
    logits = jnp.dot(h2.astype(jnp.bfloat16), w3_ref[...],
                     preferred_element_type=jnp.float32)
    out_ref[...] = (logits + b3_ref[...]).astype(out_ref.dtype)


def _round_up(x, m):
    return ((x + m - 1) // m) * m


def _pick_tm(batch):
    """Adaptive M tile: tiny single-tile for env steps, 256/512 for rollouts."""
    if batch <= 128:
        return max(8, _round_up(batch, 8))   # f32 sublane minimum is 8
    if batch <= 2048:
        return 256                            # MXU-friendly; >=2 steps at B>=512
    return 512


@functools.partial(jax.jit, static_argnames=("tm",))
def policy_network_forward(state, params, *, tm=None):
    """state: (B, 8) float32.  params: dict of (in, out) weights + (1, out) biases.

    Returns (B, 4) float32 logits (identical semantics to the PyTorch forward,
    modulo bf16 MXU-operand quantization).
    """
    B, n_in = state.shape
    n_actions = params["w3"].shape[1]
    if tm is None:
        tm = _pick_tm(B)

    n_tiles = pl.cdiv(B, tm)
    b_pad = n_tiles * tm

    # Pad batch rows to the M tile and the feature dim to 128 lanes so the
    # first-layer block load is lane-dense.  Padded rows/columns are zero.
    state_p = jnp.pad(state, ((0, b_pad - B), (0, K_PAD - n_in)))

    # bf16 weights for the MXU; biases stay f32 on the VPU path.
    w1 = jnp.pad(params["w1"], ((0, K_PAD - n_in), (0, 0))).astype(jnp.bfloat16)
    b1 = params["b1"].astype(jnp.float32)
    w2 = params["w2"].astype(jnp.bfloat16)
    b2 = params["b2"].astype(jnp.float32)
    # Pad fc3 to a lane-dense 128-wide output slab (zero columns).
    w3 = jnp.pad(params["w3"], ((0, 0), (0, N_OUT_PAD - n_actions))
                 ).astype(jnp.bfloat16)
    b3 = jnp.pad(params["b3"], ((0, 0), (0, N_OUT_PAD - n_actions))
                 ).astype(jnp.float32)

    # Grid-invariant blocks (constant index_map -> stay VMEM-resident).
    const_spec = lambda a: pl.BlockSpec(a.shape, lambda i: (0,) * a.ndim)

    out = pl.pallas_call(
        policy_mlp_kernel,
        out_shape=jax.ShapeDtypeStruct((b_pad, N_OUT_PAD), jnp.float32),
        grid=(n_tiles,),
        in_specs=[
            pl.BlockSpec((tm, K_PAD), lambda i: (i, 0)),       # states (padded)
            const_spec(w1), const_spec(b1),                    # fc1
            const_spec(w2), const_spec(b2),                    # fc2
            const_spec(w3), const_spec(b3),                    # fc3 (padded)
        ],
        out_specs=pl.BlockSpec((tm, N_OUT_PAD), lambda i: (i, 0)),
        compiler_params=pltpu.CompilerParams(
            dimension_semantics=("parallel",)),  # megacore-sharded batch axis
    )(state_p, w1, b1, w2, b2, w3, b3)

    return out[:B, :n_actions]


def init_params(key):
    """Deterministic init matching nn.Linear shapes (8->256->256->4).

    PyTorch keeps weight as (out, in); we pre-transpose to (in, out) so the
    kernel computes y = x @ W + b. Biases kept 2-D (1, out) for broadcasting.
    """
    k1, k2, k3, k4, k5, k6 = jax.random.split(key, 6)

    def uinit(k, shape, fan_in):
        bound = 1.0 / jnp.sqrt(fan_in)
        return jax.random.uniform(k, shape, jnp.float32, -bound, bound)

    return {
        "w1": uinit(k1, (8, 256), 8),      # fc1.weight.T
        "b1": uinit(k2, (1, 256), 8),      # fc1.bias
        "w2": uinit(k3, (256, 256), 256),  # fc2.weight.T
        "b2": uinit(k4, (1, 256), 256),    # fc2.bias
        "w3": uinit(k5, (256, 4), 256),    # fc3.weight.T
        "b3": uinit(k6, (1, 4), 256),      # fc3.bias
    }


def reference_forward_bf16(state, p):
    """Pure-JAX reference using the same bf16-operand / f32-accumulate path."""
    w1 = p["w1"].astype(jnp.bfloat16)
    w2 = p["w2"].astype(jnp.bfloat16)
    w3 = p["w3"].astype(jnp.bfloat16)
    h1 = jnp.dot(state.astype(jnp.bfloat16), w1,
                 preferred_element_type=jnp.float32) + p["b1"]
    h1 = jnp.maximum(h1, 0.0)
    h2 = jnp.dot(h1.astype(jnp.bfloat16), w2,
                 preferred_element_type=jnp.float32) + p["b2"]
    h2 = jnp.maximum(h2, 0.0)
    return jnp.dot(h2.astype(jnp.bfloat16), w3,
                   preferred_element_type=jnp.float32) + p["b3"]


def reference_forward_f32(state, p):
    """Pure-f32 reference matching the PyTorch Linear semantics."""
    h1 = jnp.maximum(jnp.dot(state, p["w1"],
                             preferred_element_type=jnp.float32) + p["b1"], 0.0)
    h2 = jnp.maximum(jnp.dot(h1, p["w2"],
                             preferred_element_type=jnp.float32) + p["b2"], 0.0)
    return jnp.dot(h2, p["w3"], preferred_element_type=jnp.float32) + p["b3"]


if __name__ == "__main__":
    key = jax.random.PRNGKey(0)
    pkey, skey = jax.random.split(key)

    params = init_params(pkey)

    # Batch shapes exercising all tiling paths:
    #   3   -> tm=8,  odd batch padded up (env-step path)
    #   8   -> tm=8,  exact small tile (env-step path)
    #   256 -> tm=256, single rollout tile
    #   512 -> tm=256, two parallel steps (v7x megacore)
    batches = (3, 8, 256, 512)
    skeys = jax.random.split(skey, len(batches))

    for B, sk in zip(batches, skeys):
        state = jax.random.normal(sk, (B, 8), dtype=jnp.float32)
        out = policy_network_forward(state, params)
        out = jax.block_until_ready(out)
        assert out.shape == (B, 4), out.shape

        ref_bf16 = reference_forward_bf16(state, params)
        err_bf16 = float(jnp.max(jnp.abs(out - ref_bf16)))
        assert jnp.allclose(out, ref_bf16, atol=2e-3, rtol=2e-3), (B, err_bf16)

        # Loose check against the true f32 (PyTorch) semantics.
        ref_f32 = reference_forward_f32(state, params)
        err_f32 = float(jnp.max(jnp.abs(out - ref_f32)))
        assert jnp.allclose(out, ref_f32, atol=1e-1, rtol=1e-1), (B, err_f32)

    print("KERNEL_OK")
</pallas_src>

<mosaic_0001>
module attributes {stable_mosaic.version = 11 : i64} {
  func.func @policy_mlp_kernel(%arg0: i32, %arg1: memref<8x128xf32, #tpu.memory_space<vmem>>, %arg2: memref<128x256xbf16, #tpu.memory_space<vmem>>, %arg3: memref<1x256xf32, #tpu.memory_space<vmem>>, %arg4: memref<256x256xbf16, #tpu.memory_space<vmem>>, %arg5: memref<1x256xf32, #tpu.memory_space<vmem>>, %arg6: memref<256x128xbf16, #tpu.memory_space<vmem>>, %arg7: memref<1x128xf32, #tpu.memory_space<vmem>>, %arg8: memref<8x128xf32, #tpu.memory_space<vmem>>) attributes {dimension_semantics = [#tpu.dimension_semantics<parallel>], iteration_bounds = array<i64: 1>, scalar_prefetch = 0 : i64, scratch_operands = 0 : i64, tpu.core_type = #tpu.core_type<tc>, window_params = [{transform_indices = @transform_0, window_bounds = array<i64: 8, 128>}, {pipeline_mode = #tpu.pipeline_mode<synchronous>, transform_indices = @transform_1, window_bounds = array<i64: 128, 256>}, {pipeline_mode = #tpu.pipeline_mode<synchronous>, transform_indices = @transform_2, window_bounds = array<i64: 1, 256>}, {pipeline_mode = #tpu.pipeline_mode<synchronous>, transform_indices = @transform_3, window_bounds = array<i64: 256, 256>}, {pipeline_mode = #tpu.pipeline_mode<synchronous>, transform_indices = @transform_4, window_bounds = array<i64: 1, 256>}, {pipeline_mode = #tpu.pipeline_mode<synchronous>, transform_indices = @transform_5, window_bounds = array<i64: 256, 128>}, {pipeline_mode = #tpu.pipeline_mode<synchronous>, transform_indices = @transform_6, window_bounds = array<i64: 1, 128>}, {transform_indices = @transform_7, window_bounds = array<i64: 8, 128>}]} {
    %c0 = arith.constant 0 : index
    %c0_0 = arith.constant 0 : index
    %0 = vector.load %arg1[%c0, %c0_0] : memref<8x128xf32, #tpu.memory_space<vmem>>, vector<8x128xf32>
    %1 = arith.truncf %0 : vector<8x128xf32> to vector<8x128xbf16>
    %c0_1 = arith.constant 0 : index
    %c0_2 = arith.constant 0 : index
    %2 = vector.load %arg2[%c0_1, %c0_2] : memref<128x256xbf16, #tpu.memory_space<vmem>>, vector<128x256xbf16>
    %cst = arith.constant dense<0.000000e+00> : vector<8x256xf32>
    %3 = tpu.matmul %1, %2, %cst {dimension_numbers = #tpu.dot_dimension_numbers<[1], [0], [0], [1], [0, 0, 1, 1], [], []>} : vector<8x128xbf16>, vector<128x256xbf16>, vector<8x256xf32> -> vector<8x256xf32>
    %c0_3 = arith.constant 0 : index
    %c0_4 = arith.constant 0 : index
    %4 = vector.load %arg3[%c0_3, %c0_4] : memref<1x256xf32, #tpu.memory_space<vmem>>, vector<1x256xf32>
    %5 = vector.broadcast %4 : vector<1x256xf32> to vector<8x256xf32>
    %6 = arith.addf %3, %5 : vector<8x256xf32>
    %cst_5 = arith.constant 0.000000e+00 : f32
    %7 = vector.broadcast %cst_5 : f32 to vector<8x256xf32>
    %8 = arith.maximumf %6, %7 : vector<8x256xf32>
    %9 = arith.truncf %8 : vector<8x256xf32> to vector<8x256xbf16>
    %c0_6 = arith.constant 0 : index
    %c0_7 = arith.constant 0 : index
    %10 = vector.load %arg4[%c0_6, %c0_7] : memref<256x256xbf16, #tpu.memory_space<vmem>>, vector<256x256xbf16>
    %cst_8 = arith.constant dense<0.000000e+00> : vector<8x256xf32>
    %11 = tpu.matmul %9, %10, %cst_8 {dimension_numbers = #tpu.dot_dimension_numbers<[1], [0], [0], [1], [0, 0, 1, 1], [], []>} : vector<8x256xbf16>, vector<256x256xbf16>, vector<8x256xf32> -> vector<8x256xf32>
    %c0_9 = arith.constant 0 : index
    %c0_10 = arith.constant 0 : index
    %12 = vector.load %arg5[%c0_9, %c0_10] : memref<1x256xf32, #tpu.memory_space<vmem>>, vector<1x256xf32>
    %13 = vector.broadcast %12 : vector<1x256xf32> to vector<8x256xf32>
    %14 = arith.addf %11, %13 : vector<8x256xf32>
    %cst_11 = arith.constant 0.000000e+00 : f32
    %15 = vector.broadcast %cst_11 : f32 to vector<8x256xf32>
    %16 = arith.maximumf %14, %15 : vector<8x256xf32>
    %17 = arith.truncf %16 : vector<8x256xf32> to vector<8x256xbf16>
    %c0_12 = arith.constant 0 : index
    %c0_13 = arith.constant 0 : index
    %18 = vector.load %arg6[%c0_12, %c0_13] : memref<256x128xbf16, #tpu.memory_space<vmem>>, vector<256x128xbf16>
    %cst_14 = arith.constant dense<0.000000e+00> : vector<8x128xf32>
    %19 = tpu.matmul %17, %18, %cst_14 {dimension_numbers = #tpu.dot_dimension_numbers<[1], [0], [0], [1], [0, 0, 1, 1], [], []>} : vector<8x256xbf16>, vector<256x128xbf16>, vector<8x128xf32> -> vector<8x128xf32>
    %c0_15 = arith.constant 0 : index
    %c0_16 = arith.constant 0 : index
    %20 = vector.load %arg7[%c0_15, %c0_16] : memref<1x128xf32, #tpu.memory_space<vmem>>, vector<1x128xf32>
    %21 = vector.broadcast %20 : vector<1x128xf32> to vector<8x128xf32>
    %22 = arith.addf %19, %21 : vector<8x128xf32>
    %c0_17 = arith.constant 0 : index
    %c0_18 = arith.constant 0 : index
    %23 = vector.load %arg8[%c0_17, %c0_18] : memref<8x128xf32, #tpu.memory_space<vmem>>, vector<8x128xf32>
    tpu.vector_store %arg8[%c0_17, %c0_18], %22 {strides = array<i32>} : memref<8x128xf32, #tpu.memory_space<vmem>>, vector<8x128xf32>,
    return
  }
  func.func @transform_0(%arg0: i32) -> (i32, i32) {
    %c0_i32 = arith.constant 0 : i32
    %c0_i32_0 = arith.constant 0 : i32
    return %arg0, %c0_i32 : i32, i32
  }
  func.func @transform_1(%arg0: i32) -> (i32, i32) {
    %c0_i32 = arith.constant 0 : i32
    %c0_i32_0 = arith.constant 0 : i32
    %c0_i32_1 = arith.constant 0 : i32
    return %c0_i32, %c0_i32_0 : i32, i32
  }
  func.func @transform_2(%arg0: i32) -> (i32, i32) {
    %c0_i32 = arith.constant 0 : i32
    %c0_i32_0 = arith.constant 0 : i32
    %c0_i32_1 = arith.constant 0 : i32
    return %c0_i32, %c0_i32_0 : i32, i32
  }
  func.func @transform_3(%arg0: i32) -> (i32, i32) {
    %c0_i32 = arith.constant 0 : i32
    %c0_i32_0 = arith.constant 0 : i32
    %c0_i32_1 = arith.constant 0 : i32
    return %c0_i32, %c0_i32_0 : i32, i32
  }
  func.func @transform_4(%arg0: i32) -> (i32, i32) {
    %c0_i32 = arith.constant 0 : i32
    %c0_i32_0 = arith.constant 0 : i32
    %c0_i32_1 = arith.constant 0 : i32
    return %c0_i32, %c0_i32_0 : i32, i32
  }
  func.func @transform_5(%arg0: i32) -> (i32, i32) {
    %c0_i32 = arith.constant 0 : i32
    %c0_i32_0 = arith.constant 0 : i32
    %c0_i32_1 = arith.constant 0 : i32
    return %c0_i32, %c0_i32_0 : i32, i32
  }
  func.func @transform_6(%arg0: i32) -> (i32, i32) {
    %c0_i32 = arith.constant 0 : i32
    %c0_i32_0 = arith.constant 0 : i32
    %c0_i32_1 = arith.constant 0 : i32
    return %c0_i32, %c0_i32_0 : i32, i32
  }
  func.func @transform_7(%arg0: i32) -> (i32, i32) {
    %c0_i32 = arith.constant 0 : i32
    %c0_i32_0 = arith.constant 0 : i32
    return %arg0, %c0_i32 : i32, i32
  }
}

</mosaic_0001>

<bundles_post_ra>
// kernel: policy_network_forward.1
= control target key start
LH: loop header
LB: loop body
LE: loop exit
PB: predicated region body
PF: predicated region fallthrough
CT: control target
= control target key end

     0   :  { %s1289_s1 = inlined_call_operand.vmem [shape: bf16[128,256], index: 1, kind: input, shape index: {}]   ;;  %s1290_s3 = inlined_call_operand.vmem [shape: bf16[256,256], index: 3, kind: input, shape index: {}]   ;;  %s1291_s0 = inlined_call_operand.vmem [shape: f32[8,128], index: 0, kind: input, shape index: {}]   ;;  %s1292_s5 = inlined_call_operand.vmem [shape: bf16[256,128], index: 5, kind: input, shape index: {}]   ;;  %s1293_s2 = inlined_call_operand.vmem [shape: f32[1,256], index: 2, kind: input, shape index: {}]   ;;  %s1294_s4 = inlined_call_operand.vmem [shape: f32[1,256], index: 4, kind: input, shape index: {}]   ;;  %s1295_s6 = inlined_call_operand.vmem [shape: f32[1,128], index: 6, kind: input, shape index: {}]   ;;  %s1296_s7 = inlined_call_operand.vmem [shape: f32[8,128], index: 7, kind: output, shape index: {}]  }
   0x1   :  { %v635_v0 = vld [vmem:[%s1289_s1 + $0x70] sm:$0xf]  ;;  %v848_v1 = vld [vmem:[%s1289_s1 + $0x74] sm:$0xf0]  ;;  %v847_v2 = vld [vmem:[%s1289_s1 + $0x74] sm:$0xf] }
   0x2   :  { %v636_v3 = vor.u32 %v848_v1, %v635_v0  ;;  %v637_v4 = vld [vmem:[%s1289_s1 + $0x78] sm:$0xf0]  ;;  %v627_v5 = vld [vmem:[%s1289_s1 + $0x60] sm:$0xf]  ;;  %v846_v6 = vld [vmem:[%s1289_s1 + $0x64] sm:$0xf0] }
   0x3   :  { %v640_v7 = vor.u32 %v847_v2, %v637_v4  ;;  %v845_v8 = vld [vmem:[%s1289_s1 + $0x64] sm:$0xf]  ;;  %v629_v9 = vld [vmem:[%s1289_s1 + $0x68] sm:$0xf0]  ;;  %v628_v10 = vor.u32 %v846_v6, %v627_v5  ;;  %v619_v12 = vld [vmem:[%s1289_s1 + $0x50] sm:$0xf] }
   0x4   :  { %130 = vmatpush.bf16.msra.mxu0 %v636_v3  ;;  %v632_v11 = vor.u32 %v845_v8, %v629_v9  ;;  %v844_v13 = vld [vmem:[%s1289_s1 + $0x54] sm:$0xf0]  ;;  %v843_v14 = vld [vmem:[%s1289_s1 + $0x54] sm:$0xf]  ;;  %v621_v15 = vld [vmem:[%s1289_s1 + $0x58] sm:$0xf0] }
   0x5   :  { %143 = vmatpush.bf16.msra.mxu1 %v640_v7  ;;  %v620_v16 = vor.u32 %v844_v13, %v619_v12  ;;  %v624_v17 = vor.u32 %v843_v14, %v621_v15  ;;  %v611_v18 = vld [vmem:[%s1289_s1 + $0x40] sm:$0xf]  ;;  %v842_v19 = vld [vmem:[%s1289_s1 + $0x44] sm:$0xf0]  ;;  %v841_v20 = vld [vmem:[%s1289_s1 + $0x44] sm:$0xf] }
   0x6   :  { %v613_v21 = vld [vmem:[%s1289_s1 + $0x48] sm:$0xf0]  ;;  %v612_v22 = vor.u32 %v842_v19, %v611_v18  ;;  %v699_v23 = vld [vmem:[%s1290_s3 + $0x70] sm:$0xf]  ;;  %v864_v24 = vld [vmem:[%s1290_s3 + $0x74] sm:$0xf0] }
   0x7   :  { %v763_v25 = vld [vmem:[%s1290_s3 + $0xf0] sm:$0xf]  ;;  %v616_v26 = vor.u32 %v841_v20, %v613_v21  ;;  %v840_v28 = vld [vmem:[%s1289_s1 + $0x34] sm:$0xf0]  ;;  %v700_v29 = vor.u32 %v864_v24, %v699_v23  ;;  %v839_v31 = vld [vmem:[%s1289_s1 + $0x34] sm:$0xf] }
   0x8   :  { %131 = vmatpush.bf16.msra.mxu0 %v628_v10  ;;  %v603_v27 = vld [vmem:[%s1289_s1 + $0x30] sm:$0xf]  ;;  %v880_v30 = vld [vmem:[%s1290_s3 + $0xf4] sm:$0xf0]  ;;  %v605_v32 = vld [vmem:[%s1289_s1 + $0x38] sm:$0xf0] }
   0x9   :  { %144 = vmatpush.bf16.msra.mxu1 %v632_v11  ;;  %v764_v33 = vor.u32 %v880_v30, %v763_v25  ;;  %v691_v34 = vld [vmem:[%s1290_s3 + $0x60] sm:$0xf]  ;;  %358 = vmatpush.bf16.msra.mxu2 %v700_v29  ;;  %v862_v35 = vld [vmem:[%s1290_s3 + $0x64] sm:$0xf0]  ;;  %v604_v38 = vor.u32 %v840_v28, %v603_v27  ;;  %v608_v43 = vor.u32 %v839_v31, %v605_v32  ;;  %v837_v44 = vld [vmem:[%s1289_s1 + $0x24] sm:$0xf] }
   0xa   :  { %v755_v36 = vld [vmem:[%s1290_s3 + $0xe0] sm:$0xf]  ;;  %v878_v37 = vld [vmem:[%s1290_s3 + $0xe4] sm:$0xf0]  ;;  %v692_v41 = vor.u32 %v862_v35, %v691_v34  ;;  %v683_v45 = vld [vmem:[%s1290_s3 + $0x50] sm:$0xf] }
   0xb   :  { %v595_v39 = vld [vmem:[%s1289_s1 + $0x20] sm:$0xf]  ;;  %v838_v40 = vld [vmem:[%s1289_s1 + $0x24] sm:$0xf0]  ;;  %371 = vmatpush.bf16.msra.mxu3 %v764_v33  ;;  %v756_v42 = vor.u32 %v878_v37, %v755_v36  ;;  %v860_v46 = vld [vmem:[%s1290_s3 + $0x54] sm:$0xf0] }
   0xc   :  { %132 = vmatpush.bf16.msra.mxu0 %v620_v16  ;;  %v597_v47 = vld [vmem:[%s1289_s1 + $0x28] sm:$0xf0]  ;;  %v747_v48 = vld [vmem:[%s1290_s3 + $0xd0] sm:$0xf]  ;;  %v876_v49 = vld [vmem:[%s1290_s3 + $0xd4] sm:$0xf0]  ;;  %v684_v50 = vor.u32 %v860_v46, %v683_v45  ;;  %v596_v51 = vor.u32 %v838_v40, %v595_v39 }
   0xd   :  { %145 = vmatpush.bf16.msra.mxu1 %v624_v17  ;;  %359 = vmatpush.bf16.msra.mxu2 %v692_v41  ;;  %v587_v52 = vld [vmem:[%s1289_s1 + $0x10] sm:$0xf]  ;;  %v748_v53 = vor.u32 %v876_v49, %v747_v48  ;;  %v675_v54 = vld [vmem:[%s1290_s3 + $0x40] sm:$0xf]  ;;  %v858_v55 = vld [vmem:[%s1290_s3 + $0x44] sm:$0xf0]  ;;  %v600_v56 = vor.u32 %v837_v44, %v597_v47 }
   0xe   :  { %v836_v57 = vld [vmem:[%s1289_s1 + $0x14] sm:$0xf0]  ;;  %v739_v58 = vld [vmem:[%s1290_s3 + $0xc0] sm:$0xf]  ;;  %v874_v59 = vld [vmem:[%s1290_s3 + $0xc4] sm:$0xf0]  ;;  %v676_v63 = vor.u32 %v858_v55, %v675_v54 }
   0xf   :  { %372 = vmatpush.bf16.msra.mxu3 %v756_v42  ;;  %v835_v60 = vld [vmem:[%s1289_s1 + $0x14] sm:$0xf]  ;;  %v589_v61 = vld [vmem:[%s1289_s1 + $0x18] sm:$0xf0]  ;;  %v579_v62 = vld [vmem:[%s1289_s1] sm:$0xf]  ;;  %v588_v0 = vor.u32 %v836_v57, %v587_v52  ;;  %v740_v2 = vor.u32 %v874_v59, %v739_v58 }
  0x10   :  { %133 = vmatpush.bf16.msra.mxu0 %v612_v22  ;;  %v834_v1 = vld [vmem:[%s1289_s1 + $0x4] sm:$0xf0]  ;;  %v667_v3 = vld [vmem:[%s1290_s3 + $0x30] sm:$0xf]  ;;  %v856_v4 = vld [vmem:[%s1290_s3 + $0x34] sm:$0xf0]  ;;  %v592_v5 = vor.u32 %v835_v60, %v589_v61 }
  0x11   :  { %146 = vmatpush.bf16.msra.mxu1 %v616_v26  ;;  %360 = vmatpush.bf16.msra.mxu2 %v684_v50  ;;  %v833_v6 = vld [vmem:[%s1289_s1 + $0x4] sm:$0xf]  ;;  %v731_v7 = vld [vmem:[%s1290_s3 + $0xb0] sm:$0xf]  ;;  %v872_v8 = vld [vmem:[%s1290_s3 + $0xb4] sm:$0xf0]  ;;  %v668_v14 = vor.u32 %v856_v4, %v667_v3  ;;  %v580_v15 = vor.u32 %v834_v1, %v579_v62 }
  0x12   :  { %v581_v9 = vld [vmem:[%s1289_s1 + $0x8] sm:$0xf0]  ;;  %v863_v10 = vld [vmem:[%s1290_s3 + $0x74] sm:$0xf]  ;;  %v701_v11 = vld [vmem:[%s1290_s3 + $0x78] sm:$0xf0]  ;;  %v732_v17 = vor.u32 %v872_v8, %v731_v7 }
  0x13   :  { %373 = vmatpush.bf16.msra.mxu3 %v748_v53  ;;  %v879_v12 = vld [vmem:[%s1290_s3 + $0xf4] sm:$0xf]  ;;  %v765_v13 = vld [vmem:[%s1290_s3 + $0xf8] sm:$0xf0]  ;;  %v26_v16 = vld [vmem:[%s1291_s0] sm:$0xff]  ;;  %v584_v20 = vor.u32 %v833_v6, %v581_v9  ;;  %v704_v21 = vor.u32 %v863_v10, %v701_v11 }
  0x14   :  { %134 = vmatpush.bf16.msra.mxu0 %v604_v38  ;;  %v659_v18 = vld [vmem:[%s1290_s3 + $0x20] sm:$0xf]  ;;  %v854_v19 = vld [vmem:[%s1290_s3 + $0x24] sm:$0xf0]  ;;  %v768_v24 = vor.u32 %v879_v12, %v765_v13  ;;  %v861_v25 = vld [vmem:[%s1290_s3 + $0x64] sm:$0xf]  ;;  %v27_v27 = vpack.c.bf16 %v26_v16, %v26_v16 }
  0x15   :  { %147 = vmatpush.bf16.msra.mxu1 %v608_v43  ;;  %361 = vmatpush.bf16.msra.mxu2 %v676_v63  ;;  %v723_v22 = vld [vmem:[%s1290_s3 + $0xa0] sm:$0xf]  ;;  %v870_v23 = vld [vmem:[%s1290_s3 + $0xa4] sm:$0xf0]  ;;  %v693_v26 = vld [vmem:[%s1290_s3 + $0x68] sm:$0xf0]  ;;  %v660_v30 = vor.u32 %v854_v19, %v659_v18 }
  0x16   :  { %v877_v28 = vld [vmem:[%s1290_s3 + $0xe4] sm:$0xf]  ;;  %v757_v29 = vld [vmem:[%s1290_s3 + $0xe8] sm:$0xf0]  ;;  %v724_v31 = vor.u32 %v870_v23, %v723_v22  ;;  %v696_v32 = vor.u32 %v861_v25, %v693_v26  ;;  %v859_v34 = vld [vmem:[%s1290_s3 + $0x54] sm:$0xf] }
  0x17   :  { %374 = vmatpush.bf16.msra.mxu3 %v740_v2  ;;  %v760_v33 = vor.u32 %v877_v28, %v757_v29  ;;  %v685_v35 = vld [vmem:[%s1290_s3 + $0x58] sm:$0xf0]  ;;  %v875_v36 = vld [vmem:[%s1290_s3 + $0xd4] sm:$0xf]  ;;  %v857_v40 = vld [vmem:[%s1290_s3 + $0x44] sm:$0xf] }
  0x18   :  { %135 = vmatpush.bf16.msra.mxu0 %v596_v51  ;;  %v749_v37 = vld [vmem:[%s1290_s3 + $0xd8] sm:$0xf0]  ;;  %v688_v38 = vor.u32 %v859_v34, %v685_v35  ;;  %v677_v41 = vld [vmem:[%s1290_s3 + $0x48] sm:$0xf0]  ;;  %v873_v42 = vld [vmem:[%s1290_s3 + $0xc4] sm:$0xf] }
  0x19   :  { %148 = vmatpush.bf16.msra.mxu1 %v600_v56  ;;  %362 = vmatpush.bf16.msra.mxu2 %v668_v14  ;;  %v752_v39 = vor.u32 %v875_v36, %v749_v37  ;;  %v741_v43 = vld [vmem:[%s1290_s3 + $0xc8] sm:$0xf0]  ;;  %v680_v44 = vor.u32 %v857_v40, %v677_v41  ;;  %v855_v46 = vld [vmem:[%s1290_s3 + $0x34] sm:$0xf]  ;;  %v669_v47 = vld [vmem:[%s1290_s3 + $0x38] sm:$0xf0] }
  0x1a   :  { %v744_v45 = vor.u32 %v873_v42, %v741_v43  ;;  %v871_v48 = vld [vmem:[%s1290_s3 + $0xb4] sm:$0xf]  ;;  %v733_v49 = vld [vmem:[%s1290_s3 + $0xb8] sm:$0xf0]  ;;  %v672_v50 = vor.u32 %v855_v46, %v669_v47  ;;  %v853_v52 = vld [vmem:[%s1290_s3 + $0x24] sm:$0xf] }
  0x1b   :  { %375 = vmatpush.bf16.msra.mxu3 %v732_v17  ;;  %v736_v51 = vor.u32 %v871_v48, %v733_v49  ;;  %v661_v53 = vld [vmem:[%s1290_s3 + $0x28] sm:$0xf0]  ;;  %v869_v54 = vld [vmem:[%s1290_s3 + $0xa4] sm:$0xf]  ;;  %v651_v58 = vld [vmem:[%s1290_s3 + $0x10] sm:$0xf] }
  0x1c   :  { %136 = vmatpush.bf16.msra.mxu0 %v588_v0  ;;  %v725_v55 = vld [vmem:[%s1290_s3 + $0xa8] sm:$0xf0]  ;;  %v664_v56 = vor.u32 %v853_v52, %v661_v53  ;;  %v852_v59 = vld [vmem:[%s1290_s3 + $0x14] sm:$0xf0]  ;;  %v715_v60 = vld [vmem:[%s1290_s3 + $0x90] sm:$0xf] }
  0x1d   :  { %149 = vmatpush.bf16.msra.mxu1 %v592_v5  ;;  %363 = vmatpush.bf16.msra.mxu2 %v660_v30  ;;  %v728_v57 = vor.u32 %v869_v54, %v725_v55  ;;  %v652_v61 = vor.u32 %v852_v59, %v651_v58  ;;  %v868_v62 = vld [vmem:[%s1290_s3 + $0x94] sm:$0xf0]  ;;  %v851_v63 = vld [vmem:[%s1290_s3 + $0x14] sm:$0xf]  ;;  %v653_v0 = vld [vmem:[%s1290_s3 + $0x18] sm:$0xf0] }
  0x1e   :  { %v716_v1 = vor.u32 %v868_v62, %v715_v60  ;;  %v656_v2 = vor.u32 %v851_v63, %v653_v0  ;;  %v867_v3 = vld [vmem:[%s1290_s3 + $0x94] sm:$0xf]  ;;  %v717_v4 = vld [vmem:[%s1290_s3 + $0x98] sm:$0xf0]  ;;  %v643_v6 = vld [vmem:[%s1290_s3] sm:$0xf] }
  0x1f   :  { %376 = vmatpush.bf16.msra.mxu3 %v724_v31  ;;  %v720_v5 = vor.u32 %v867_v3, %v717_v4  ;;  %v850_v7 = vld [vmem:[%s1290_s3 + $0x4] sm:$0xf0]  ;;  %v707_v8 = vld [vmem:[%s1290_s3 + $0x80] sm:$0xf]  ;;  %v849_v11 = vld [vmem:[%s1290_s3 + $0x4] sm:$0xf] }
  0x20   :  { %137 = vmatpush.bf16.msra.mxu0 %v580_v15  ;;  %v644_v9 = vor.u32 %v850_v7, %v643_v6  ;;  %v866_v10 = vld [vmem:[%s1290_s3 + $0x84] sm:$0xf0]  ;;  %v645_v12 = vld [vmem:[%s1290_s3 + $0x8] sm:$0xf0]  ;;  %v865_v15 = vld [vmem:[%s1290_s3 + $0x84] sm:$0xf] }
  0x21   :  { %150 = vmatpush.bf16.msra.mxu1 %v584_v20  ;;  %364 = vmatpush.bf16.msra.mxu2 %v652_v61  ;;  %v708_v13 = vor.u32 %v866_v10, %v707_v8  ;;  %v648_v14 = vor.u32 %v849_v11, %v645_v12  ;;  %v709_v16 = vld [vmem:[%s1290_s3 + $0x88] sm:$0xf0]  ;;  %v896_v18 = vld [vmem:[%s1292_s5 + $0x78] sm:$0xff]  ;;  %v895_v20 = vld [vmem:[%s1292_s5 + $0x70] sm:$0xff] }
  0x22   :  { %v712_v17 = vor.u32 %v865_v15, %v709_v16  ;;  %v888_v19 = vld [vmem:[%s1292_s5 + $0x38] sm:$0xff]  ;;  %v894_v22 = vld [vmem:[%s1292_s5 + $0x68] sm:$0xff]  ;;  %v885_v25 = vld [vmem:[%s1292_s5 + $0x20] sm:$0xff] }
  0x23   :  { %138 = vmatmul.bf16.vlgmr.msra.gmra.mxu0 %v27_v27  ;;  %377 = vmatpush.bf16.msra.mxu3 %v716_v1  ;;  %v886_v23 = vld [vmem:[%s1292_s5 + $0x28] sm:$0xff]  ;;  %v892_v26 = vld [vmem:[%s1292_s5 + $0x58] sm:$0xff]  ;;  %v891_v28 = vld [vmem:[%s1292_s5 + $0x50] sm:$0xff] }
  0x24   :  { %384 = vmatpush.bf16.msrb.mxu0 %v704_v21  ;;  %151 = vmatmul.bf16.vlgmr.msra.gmra.mxu1 %v27_v27  ;;  %v887_v21 = vld [vmem:[%s1292_s5 + $0x30] sm:$0xff]  ;;  %v44_v27 = vld [vmem:[%s1293_s2] sm:$0x3]  ;;  %v884_v41 = vld [vmem:[%s1292_s5 + $0x18] sm:$0xff] }
  0x25   :  { %397 = vmatpush.bf16.msrb.mxu1 %v768_v24  ;;  %365 = vmatpush.bf16.msra.mxu2 %v644_v9  ;;  %v893_v24 = vld [vmem:[%s1292_s5 + $0x60] sm:$0xff]  ;;  %v46_v29 = vperm.slane %v44_v27, 0  ;;  %v47_v30 = vperm.slane %v44_v27, 1  ;;  %v890_v42 = vld [vmem:[%s1292_s5 + $0x48] sm:$0xff]  ;;  %v883_v43 = vld [vmem:[%s1292_s5 + $0x10] sm:$0xff] }
  0x26   :  { %v881_v46 = vld [vmem:[%s1292_s5] sm:$0xff] }
  0x27   :  { %378 = vmatpush.bf16.msra.mxu3 %v708_v13  ;;  %v192_v47 = vld [vmem:[%s1294_s4] sm:$0x3] }
  0x28   :  { %385 = vmatpush.bf16.msrb.mxu0 %v696_v32  ;;  %v195_v48 = vperm.slane %v192_v47, 1  ;;  %v194_v53 = vperm.slane %v192_v47, 0  ;;  %v897_v3 = vld [vmem:[%s1295_s6] ss:$0 sm:$0xff] }
  0x29   :  { %398 = vmatpush.bf16.msrb.mxu1 %v760_v33  ;;  %546 = vmatpush.bf16.msrb.mxu2 %v888_v19 }
  0x2b   :  { %559 = vmatpush.bf16.msrb.mxu3 %v896_v18 }
  0x2c   :  { %386 = vmatpush.bf16.msrb.mxu0 %v688_v38 }
  0x2d   :  { %399 = vmatpush.bf16.msrb.mxu1 %v752_v39  ;;  %547 = vmatpush.bf16.msrb.mxu2 %v887_v21 }
  0x2f   :  { %560 = vmatpush.bf16.msrb.mxu3 %v895_v20 }
  0x30   :  { %387 = vmatpush.bf16.msrb.mxu0 %v680_v44  ;;  %v889_v44 = vld [vmem:[%s1292_s5 + $0x40] sm:$0xff] }
  0x31   :  { %400 = vmatpush.bf16.msrb.mxu1 %v744_v45  ;;  %548 = vmatpush.bf16.msrb.mxu2 %v886_v23  ;;  %v882_v45 = vld [vmem:[%s1292_s5 + $0x8] sm:$0xff] }
  0x33   :  { %561 = vmatpush.bf16.msrb.mxu3 %v894_v22 }
  0x34   :  { %388 = vmatpush.bf16.msrb.mxu0 %v672_v50 }
  0x35   :  { %401 = vmatpush.bf16.msrb.mxu1 %v736_v51  ;;  %549 = vmatpush.bf16.msrb.mxu2 %v885_v25 }
  0x37   :  { %562 = vmatpush.bf16.msrb.mxu3 %v893_v24 }
  0x38   :  { %389 = vmatpush.bf16.msrb.mxu0 %v664_v56 }
  0x39   :  { %402 = vmatpush.bf16.msrb.mxu1 %v728_v57  ;;  %550 = vmatpush.bf16.msrb.mxu2 %v884_v41 }
  0x3b   :  { %563 = vmatpush.bf16.msrb.mxu3 %v892_v26 }
  0x3c   :  { %390 = vmatpush.bf16.msrb.mxu0 %v656_v2 }
  0x3d   :  { %403 = vmatpush.bf16.msrb.mxu1 %v720_v5  ;;  %551 = vmatpush.bf16.msrb.mxu2 %v883_v43 }
  0x3f   :  { %564 = vmatpush.bf16.msrb.mxu3 %v891_v28 }
  0x40   :  { %391 = vmatpush.bf16.msrb.mxu0 %v648_v14 }
  0x41   :  { %404 = vmatpush.bf16.msrb.mxu1 %v712_v17  ;;  %552 = vmatpush.bf16.msrb.mxu2 %v882_v45 }
  0x43   :  { %565 = vmatpush.bf16.msrb.mxu3 %v890_v42 }
  0x45   :  { %553 = vmatpush.bf16.msrb.mxu2 %v881_v46 }
  0x47   :  { %566 = vmatpush.bf16.msrb.mxu3 %v889_v44 }
  0xa0   :  { %v139_v31 = vpop.f32.mrf.mxu0 }
  0xa1   :  { %v140_v32 = vadd.f32 %v139_v31, %v46_v29  ;;  %v152_v33 = vpop.f32.mrf.mxu1 }
  0xa2   :  { %v153_v34 = vadd.f32 %v152_v33, %v47_v30 }
  0xa3   :  { %v156_v35 = vmax.f32 %v140_v32, 0.0 }
  0xa4   :  { %v157_v36 = vmax.f32 %v153_v34, 0.0 }
  0xa5   :  { %v158_v37 = vpack.c.bf16 %v156_v35, %v156_v35 }
  0xa6   :  { %v159_v38 = vpack.c.bf16 %v157_v36, %v157_v36 }
  0xa7   :  { %366 = vmatmul.bf16.vlgmr.msra.gmra.mxu2 %v158_v37  ;;  %392 = vmatmul.bf16.vlgmr.msrb.gmra.mxu0 %v158_v37 }
  0xa8   :  { %379 = vmatmul.bf16.vlgmr.msra.gmra.mxu3 %v159_v38  ;;  %405 = vmatmul.bf16.vlgmr.msrb.gmra.mxu1 %v159_v38  ;;  %v141_v39 = vpop.f32.mrf.mxu0 }
  0xa9   :  { %v154_v40 = vpop.f32.mrf.mxu1 }
 0x124   :  { %v393_v49 = vpop.f32.mrf.mxu0 }
 0x125   :  { %v394_v50 = vadd.f32 %v393_v49, %v195_v48  ;;  %v406_v51 = vpop.f32.mrf.mxu1 }
 0x127   :  { %v407_v52 = vadd.f32 %v406_v51, %v394_v50 }
 0x129   :  { %v411_v54 = vmax.f32 %v407_v52, 0.0 }
 0x12a   :  { %v367_v55 = vpop.f32.mrf.mxu2 }
 0x12b   :  { %v413_v56 = vpack.c.bf16 %v411_v54, %v411_v54  ;;  %v368_v57 = vadd.f32 %v367_v55, %v194_v53  ;;  %v380_v58 = vpop.f32.mrf.mxu3 }
 0x12c   :  { %v395_v59 = vpop.f32.mrf.mxu0 }
 0x12d   :  { %v381_v60 = vadd.f32 %v380_v58, %v368_v57  ;;  %v408_v61 = vpop.f32.mrf.mxu1  ;;  %567 = vmatmul.bf16.vlgmr.msrb.gmra.mxu3 %v413_v56 }
 0x12f   :  { %v410_v62 = vmax.f32 %v381_v60, 0.0 }
 0x131   :  { %v412_v63 = vpack.c.bf16 %v410_v62, %v410_v62 }
 0x132   :  { %v369_v0 = vpop.f32.mrf.mxu2 }
 0x133   :  { %v382_v1 = vpop.f32.mrf.mxu3  ;;  %554 = vmatmul.bf16.vlgmr.msrb.gmra.mxu2 %v412_v63 }
 0x1b0   :  { %v568_v2 = vpop.f32.mrf.mxu3 }
 0x1b6   :  { %v555_v4 = vpop.f32.mrf.mxu2 }
 0x1b7   :  { %v556_v5 = vadd.f32 %v897_v3, %v555_v4 }
 0x1b8   :  { %v570_v6 = vpop.f32.mrf.mxu3 }
 0x1b9   :  { %v569_v7 = vadd.f32 %v568_v2, %v556_v5 }
 0x1bb   :  { %572 = vst [vmem:[%s1296_s7] sm:$0xff] %v569_v7 }
 0x1be   :  { %v557_v8 = vpop.f32.mrf.mxu2 }

</bundles_post_ra>
